<compile_context>
chip_gen: v5e
topology: v5e:2x2
jax: 0.10.0
libtpu: 0.0.40
codegen_flags: <defaults>
</compile_context>

<pallas_src>
import functools

import jax
import jax.numpy as jnp
from jax import lax
from jax.experimental import pallas as pl
from jax.experimental.pallas import tpu as pltpu


# dot_general dimension numbers for 2-D operands
_NT = (((1,), (1,)), ((), ()))   # a @ b^T
_TN = (((0,), (0,)), ((), ()))   # a^T @ b


def _msva_kernel(xq_ref, xf_ref, w_qv_ref, wk_ref, wo_ref,
                 y_ref, att_ref, acc_ref, *,
                 seq_len, q_tile, dout, apperture, kv_win, use_band):
    f32 = jnp.float32
    cdtype = xq_ref.dtype
    qi = pl.program_id(1)
    nq = pl.num_programs(1)
    partial_tile = (seq_len % q_tile) != 0

    mm = functools.partial(lax.dot_general, preferred_element_type=f32)

    @pl.when(qi == 0)
    def _init():
        acc_ref[...] = jnp.zeros_like(acc_ref)

    q_start = qi * q_tile

    xq = xq_ref[0]                                              # (TQ, Din)
    if partial_tile:
        # Zero padded query rows of the last tile so garbage can't reach y.
        row_ok = (q_start + lax.broadcasted_iota(jnp.int32, (q_tile, 1), 0)
                  ) < seq_len
        xq = jnp.where(row_ok, xq, jnp.zeros_like(xq))

    # Fused Q/V projection for this q-tile (0.06 folded into the Wq rows).
    qv = mm(xq, w_qv_ref[...], _NT)                             # (TQ, 2*Dout) f32
    q = qv[:, :dout].astype(cdtype)
    v = qv[:, dout:].astype(cdtype)

    # K over the (banded) key window.
    if use_band:
        kv0 = jnp.clip(((q_start - apperture + 1) // 128) * 128,
                       0, seq_len - kv_win)
        kv0 = pl.multiple_of(kv0, 128)
        x_kv = xf_ref[0, pl.ds(kv0, kv_win), :]                 # (KW, Din)
    else:
        kv0 = 0
        x_kv = xf_ref[0]                                        # (S, Din)
    k = mm(x_kv, wk_ref[...], _NT).astype(cdtype)               # (KW, Dout)

    logits = mm(q, k, _NT)                                      # (TQ, KW) f32

    kw = k.shape[0]
    if apperture > 0:
        rows = q_start + lax.broadcasted_iota(jnp.int32, (q_tile, kw), 0)
        cols = kv0 + lax.broadcasted_iota(jnp.int32, (q_tile, kw), 1)
        logits = jnp.where(jnp.abs(rows - cols) >= apperture, -jnp.inf, logits)

    # Numerically stable softmax over the key window (EUP reciprocal, exact).
    m = jnp.max(logits, axis=-1, keepdims=True)
    e = jnp.exp(logits - m)
    denom = jnp.sum(e, axis=-1, keepdims=True)
    att = e * pl.reciprocal(denom, approx=False)                # (TQ, KW) f32

    # Store this q-tile's att rows (zero outside the key window in band mode).
    if use_band:
        att_ref[0] = jnp.zeros((q_tile, seq_len), dtype=att_ref.dtype)
        att_ref[0, :, pl.ds(kv0, kv_win)] = att.astype(att_ref.dtype)
    else:
        att_ref[0] = att.astype(att_ref.dtype)

    # y accumulation: y[i] += sum_a att[a, i] * V[a] over this tile's rows a.
    att_y = att
    if partial_tile:
        att_y = jnp.where(row_ok, att, jnp.zeros_like(att))     # kill NaN pad rows
    contrib = mm(att_y.astype(cdtype), v, _TN)                  # (KW, Dout) f32
    if use_band:
        acc_ref[pl.ds(kv0, kv_win), :] = acc_ref[pl.ds(kv0, kv_win), :] + contrib
    else:
        acc_ref[...] = acc_ref[...] + contrib

    @pl.when(qi == nq - 1)
    def _finalize():
        y = mm(acc_ref[...].astype(cdtype), wo_ref[...], _NT)   # (S, Din) f32
        y_ref[0] = y.astype(y_ref.dtype)


@functools.lru_cache(maxsize=1)
def _vmem_limit_bytes():
    # Generation-aware scoped-VMEM budget (v5e/v6e: ~96-100 MiB, v7x: ~48 MiB).
    try:
        cap = int(pltpu.get_tpu_info().vmem_capacity_bytes)
        return max(min((cap * 3) // 4, 100 * 1024 * 1024), 32 * 1024 * 1024)
    except Exception:
        return 32 * 1024 * 1024


def msva_self_attention(x, wk, wq, wv, wo, *, apperture=0, scale=0.06,
                        q_tile=None):
    """x: (B, S, Din); wk/wq/wv: (Dout, Din); wo: (Din, Dout) (torch layout).

    Returns (y, att_weights) matching MSVA_SelfAttention.forward in eval mode.
    """
    b, s, din = x.shape
    dout = wk.shape[0]
    app = int(apperture)

    # Query-tile size: full S when small, otherwise a multiple of 8 capped at 256.
    if q_tile is None:
        q_tile = s if s <= 256 else 256
    q_tile = int(min(q_tile, s))
    if q_tile < s:
        q_tile = max(8, (q_tile // 8) * 8)
    nq = pl.cdiv(s, q_tile)

    # Banded-attention key window, 128-aligned so windowed stores stay
    # lane-tile aligned.  Width covers the band plus alignment slack.
    use_band = False
    kv_win = s
    if app > 0 and s % 128 == 0:
        win = -(-(q_tile + 2 * app + 125) // 128) * 128
        if win < s:
            use_band = True
            kv_win = win

    # Fold the 0.06 Q scale into Wq and fuse the Q/V projection weights.
    w_qv = jnp.concatenate([wq * jnp.asarray(scale, wq.dtype), wv], axis=0)

    kernel = functools.partial(
        _msva_kernel, seq_len=s, q_tile=q_tile, dout=dout,
        apperture=app, kv_win=kv_win, use_band=use_band)

    y, att = pl.pallas_call(
        kernel,
        out_shape=(
            jax.ShapeDtypeStruct((b, s, din), x.dtype),
            jax.ShapeDtypeStruct((b, s, s), jnp.float32),
        ),
        grid_spec=pltpu.PrefetchScalarGridSpec(
            num_scalar_prefetch=0,
            grid=(b, nq),
            in_specs=[
                pl.BlockSpec((1, q_tile, din), lambda i, j: (i, j, 0)),  # x (q rows)
                pl.BlockSpec((1, s, din), lambda i, j: (i, 0, 0)),       # x (kv rows)
                pl.BlockSpec((2 * dout, din), lambda i, j: (0, 0)),      # [Wq*0.06; Wv]
                pl.BlockSpec((dout, din), lambda i, j: (0, 0)),          # Wk
                pl.BlockSpec((din, dout), lambda i, j: (0, 0)),          # Wo
            ],
            out_specs=[
                pl.BlockSpec((1, s, din), lambda i, j: (i, 0, 0)),       # y (accum.)
                pl.BlockSpec((1, q_tile, s), lambda i, j: (i, j, 0)),    # att
            ],
            scratch_shapes=[pltpu.VMEM((s, dout), jnp.float32)],
        ),
        compiler_params=pltpu.CompilerParams(
            dimension_semantics=("parallel", "arbitrary"),
            vmem_limit_bytes=_vmem_limit_bytes(),
        ),
    )(x, x, w_qv, wk, wo)
    return y, att


# ---------------------------------------------------------------------------
# Pure-JAX reference (mirrors the PyTorch forward, eval mode).
def _reference(x, wk, wq, wv, wo, apperture):
    s = x.shape[1]
    K = jnp.einsum('bsd,od->bso', x, wk)
    Q = jnp.einsum('bsd,od->bso', x, wq) * 0.06
    V = jnp.einsum('bsd,od->bso', x, wv)
    logits = jnp.einsum('bqo,bko->bqk', Q, K)
    if apperture > 0:
        i = jnp.arange(s)[:, None]
        j = jnp.arange(s)[None, :]
        banned = (jnp.abs(i - j) >= apperture)[None, :, :]
        logits = jnp.where(banned, -jnp.inf, logits)
    att = jax.nn.softmax(logits, axis=-1)
    y = jnp.einsum('bqk,bqo->bko', att, V)        # (V^T @ att)^T == att^T @ V
    y = jnp.einsum('bko,do->bkd', y, wo)          # @ Wo^T
    return y, att


def _check(name, key, batch, seq, din, dout, apperture, q_tile=None):
    kx, kk, kq, kv, ko = jax.random.split(key, 5)
    x = jax.random.normal(kx, (batch, seq, din), jnp.float32)
    wk = jax.random.normal(kk, (dout, din), jnp.float32) * 0.1
    wq = jax.random.normal(kq, (dout, din), jnp.float32) * 0.1
    wv = jax.random.normal(kv, (dout, din), jnp.float32) * 0.1
    wo = jax.random.normal(ko, (din, dout), jnp.float32) * 0.1

    y, att = msva_self_attention(x, wk, wq, wv, wo,
                                 apperture=apperture, q_tile=q_tile)
    y = jax.block_until_ready(y)
    att = jax.block_until_ready(att)

    y_ref, att_ref = _reference(x, wk, wq, wv, wo, apperture)
    assert jnp.allclose(att, att_ref, atol=1e-2, rtol=1e-2), (
        f"{name}: att mismatch, max err {jnp.max(jnp.abs(att - att_ref))}")
    assert jnp.allclose(y, y_ref, atol=1e-2, rtol=1e-2), (
        f"{name}: y mismatch, max err {jnp.max(jnp.abs(y - y_ref))}")


if __name__ == "__main__":
    root = jax.random.PRNGKey(0)
    k_a, k_b, k_c = jax.random.split(root, 3)

    # A) toy shapes from the module spec (single q-tile, full-width softmax).
    _check("small", k_a, batch=2, seq=8, din=32, dout=32, apperture=4)

    # B) multi q-tile + band-aware KV window (S % 128 == 0, window 256 < S=384).
    _check("banded", k_b, batch=2, seq=384, din=32, dout=64, apperture=24,
           q_tile=64)

    # C) partial last q-tile (S=40, TQ=16) with no mask (apperture=0).
    _check("ragged", k_c, batch=1, seq=40, din=32, dout=32, apperture=0,
           q_tile=16)

    print("KERNEL_OK")
</pallas_src>

<mosaic_0001>
module attributes {stable_mosaic.version = 11 : i64} {
  func.func @_msva_kernel(%arg0: i32, %arg1: i32, %arg2: memref<1x8x32xf32, #tpu.memory_space<vmem>>, %arg3: memref<1x8x32xf32, #tpu.memory_space<vmem>>, %arg4: memref<64x32xf32, #tpu.memory_space<vmem>>, %arg5: memref<32x32xf32, #tpu.memory_space<vmem>>, %arg6: memref<32x32xf32, #tpu.memory_space<vmem>>, %arg7: memref<1x8x32xf32, #tpu.memory_space<vmem>>, %arg8: memref<1x8x8xf32, #tpu.memory_space<vmem>>, %arg9: memref<8x32xf32, #tpu.memory_space<vmem>>) attributes {dimension_semantics = [#tpu.dimension_semantics<parallel>, #tpu.dimension_semantics<arbitrary>], iteration_bounds = array<i64: 2, 1>, scalar_prefetch = 0 : i64, scratch_operands = 1 : i64, tpu.core_type = #tpu.core_type<tc>, window_params = [{transform_indices = @transform_0, window_bounds = array<i64: 1, 8, 32>}, {transform_indices = @transform_1, window_bounds = array<i64: 1, 8, 32>}, {pipeline_mode = #tpu.pipeline_mode<synchronous>, transform_indices = @transform_2, window_bounds = array<i64: 64, 32>}, {pipeline_mode = #tpu.pipeline_mode<synchronous>, transform_indices = @transform_3, window_bounds = array<i64: 32, 32>}, {pipeline_mode = #tpu.pipeline_mode<synchronous>, transform_indices = @transform_4, window_bounds = array<i64: 32, 32>}, {transform_indices = @transform_5, window_bounds = array<i64: 1, 8, 32>}, {transform_indices = @transform_6, window_bounds = array<i64: 1, 8, 8>}]} {
    %c0_i32 = arith.constant 0 : i32
    %0 = arith.cmpi eq, %arg1, %c0_i32 : i32
    %1 = arith.extui %0 : i1 to i32
    %c0_i32_0 = arith.constant 0 : i32
    %2 = arith.cmpi ne, %1, %c0_i32_0 : i32
    scf.if %2 {
      %cst_26 = arith.constant 0.000000e+00 : f32
      %47 = vector.broadcast %cst_26 : f32 to vector<8x32xf32>
      %c0_27 = arith.constant 0 : index
      %c0_28 = arith.constant 0 : index
      %48 = vector.load %arg9[%c0_27, %c0_28] : memref<8x32xf32, #tpu.memory_space<vmem>>, vector<8x32xf32>
      tpu.vector_store %arg9[%c0_27, %c0_28], %47 {strides = array<i32>} : memref<8x32xf32, #tpu.memory_space<vmem>>, vector<8x32xf32>,
    } else {
    }
    %c8_i32 = arith.constant 8 : i32
    %3 = arith.muli %arg1, %c8_i32 : i32
    %c0 = arith.constant 0 : index
    %c0_1 = arith.constant 0 : index
    %c0_2 = arith.constant 0 : index
    %4 = vector.load %arg2[%c0, %c0_1, %c0_2] : memref<1x8x32xf32, #tpu.memory_space<vmem>>, vector<1x8x32xf32>
    %5 = vector.shape_cast %4 : vector<1x8x32xf32> to vector<8x32xf32>
    %c0_3 = arith.constant 0 : index
    %c0_4 = arith.constant 0 : index
    %6 = vector.load %arg4[%c0_3, %c0_4] : memref<64x32xf32, #tpu.memory_space<vmem>>, vector<64x32xf32>
    %cst = arith.constant dense<0.000000e+00> : vector<8x64xf32>
    %7 = tpu.matmul %5, %6, %cst {dimension_numbers = #tpu.dot_dimension_numbers<[1], [1], [0], [0], [0, 0, 1, 0], [], []>} : vector<8x32xf32>, vector<64x32xf32>, vector<8x64xf32> -> vector<8x64xf32>
    %8 = vector.extract_strided_slice %7 {offsets = [0, 0], sizes = [8, 32], strides = [1, 1]} : vector<8x64xf32> to vector<8x32xf32>
    %9 = vector.extract_strided_slice %7 {offsets = [0, 32], sizes = [8, 32], strides = [1, 1]} : vector<8x64xf32> to vector<8x32xf32>
    %c0_5 = arith.constant 0 : index
    %c0_6 = arith.constant 0 : index
    %c0_7 = arith.constant 0 : index
    %10 = vector.load %arg3[%c0_5, %c0_6, %c0_7] : memref<1x8x32xf32, #tpu.memory_space<vmem>>, vector<1x8x32xf32>
    %11 = vector.shape_cast %10 : vector<1x8x32xf32> to vector<8x32xf32>
    %c0_8 = arith.constant 0 : index
    %c0_9 = arith.constant 0 : index
    %12 = vector.load %arg5[%c0_8, %c0_9] : memref<32x32xf32, #tpu.memory_space<vmem>>, vector<32x32xf32>
    %cst_10 = arith.constant dense<0.000000e+00> : vector<8x32xf32>
    %13 = tpu.matmul %11, %12, %cst_10 {dimension_numbers = #tpu.dot_dimension_numbers<[1], [1], [0], [0], [0, 0, 1, 0], [], []>} : vector<8x32xf32>, vector<32x32xf32>, vector<8x32xf32> -> vector<8x32xf32>
    %cst_11 = arith.constant dense<0.000000e+00> : vector<8x8xf32>
    %14 = tpu.matmul %8, %13, %cst_11 {dimension_numbers = #tpu.dot_dimension_numbers<[1], [1], [0], [0], [0, 0, 1, 0], [], []>} : vector<8x32xf32>, vector<8x32xf32>, vector<8x8xf32> -> vector<8x8xf32>
    %15 = tpu.iota {dimensions = array<i32: 0>} : vector<8x8xi32>
    %16 = vector.broadcast %3 : i32 to vector<8x8xi32>
    %17 = arith.addi %16, %15 : vector<8x8xi32>
    %18 = tpu.iota {dimensions = array<i32: 1>} : vector<8x8xi32>
    %c0_i32_12 = arith.constant 0 : i32
    %19 = vector.broadcast %c0_i32_12 : i32 to vector<8x8xi32>
    %20 = arith.addi %19, %18 : vector<8x8xi32>
    %21 = arith.subi %17, %20 : vector<8x8xi32>
    %22 = math.absi %21 : vector<8x8xi32>
    %c4_i32 = arith.constant 4 : i32
    %23 = vector.broadcast %c4_i32 : i32 to vector<8x8xi32>
    %24 = arith.cmpi sge, %22, %23 : vector<8x8xi32>
    %cst_13 = arith.constant 0xFF800000 : f32
    %25 = vector.broadcast %cst_13 : f32 to vector<8x8xf32>
    %26 = arith.select %24, %25, %14 : vector<8x8xi1>, vector<8x8xf32>
    %cst_14 = arith.constant dense<0xFF800000> : vector<8xf32>
    %27 = vector.multi_reduction <maximumf>, %26, %cst_14 [1] : vector<8x8xf32> to vector<8xf32>
    %28 = vector.shape_cast %27 : vector<8xf32> to vector<8x1xf32>
    %29 = vector.broadcast %28 : vector<8x1xf32> to vector<8x8xf32>
    %30 = arith.subf %26, %29 : vector<8x8xf32>
    %31 = math.exp %30 : vector<8x8xf32>
    %cst_15 = arith.constant dense<0.000000e+00> : vector<8xf32>
    %32 = vector.multi_reduction <add>, %31, %cst_15 [1] : vector<8x8xf32> to vector<8xf32>
    %33 = vector.shape_cast %32 : vector<8xf32> to vector<8x1xf32>
    %34 = tpu.reciprocal %33 : vector<8x1xf32> -> vector<8x1xf32>
    %35 = vector.broadcast %34 : vector<8x1xf32> to vector<8x8xf32>
    %36 = arith.mulf %31, %35 : vector<8x8xf32>
    %c0_16 = arith.constant 0 : index
    %c0_17 = arith.constant 0 : index
    %c0_18 = arith.constant 0 : index
    %37 = vector.load %arg8[%c0_16, %c0_17, %c0_18] : memref<1x8x8xf32, #tpu.memory_space<vmem>>, vector<1x8x8xf32>
    %38 = vector.shape_cast %37 : vector<1x8x8xf32> to vector<8x8xf32>
    %39 = vector.shape_cast %36 : vector<8x8xf32> to vector<1x8x8xf32>
    tpu.vector_store %arg8[%c0_16, %c0_17, %c0_18], %39 {strides = array<i32>} : memref<1x8x8xf32, #tpu.memory_space<vmem>>, vector<1x8x8xf32>,
    %cst_19 = arith.constant dense<0.000000e+00> : vector<8x32xf32>
    %40 = tpu.matmul %36, %9, %cst_19 {dimension_numbers = #tpu.dot_dimension_numbers<[0], [0], [1], [1], [0, 1, 1, 1], [], []>} : vector<8x8xf32>, vector<8x32xf32>, vector<8x32xf32> -> vector<8x32xf32>
    %c0_20 = arith.constant 0 : index
    %c0_21 = arith.constant 0 : index
    %41 = vector.load %arg9[%c0_20, %c0_21] : memref<8x32xf32, #tpu.memory_space<vmem>>, vector<8x32xf32>
    %42 = arith.addf %41, %40 : vector<8x32xf32>
    %c0_22 = arith.constant 0 : index
    %c0_23 = arith.constant 0 : index
    %43 = vector.load %arg9[%c0_22, %c0_23] : memref<8x32xf32, #tpu.memory_space<vmem>>, vector<8x32xf32>
    tpu.vector_store %arg9[%c0_22, %c0_23], %42 {strides = array<i32>} : memref<8x32xf32, #tpu.memory_space<vmem>>, vector<8x32xf32>,
    %c0_i32_24 = arith.constant 0 : i32
    %44 = arith.cmpi eq, %arg1, %c0_i32_24 : i32
    %45 = arith.extui %44 : i1 to i32
    %c0_i32_25 = arith.constant 0 : i32
    %46 = arith.cmpi ne, %45, %c0_i32_25 : i32
    scf.if %46 {
      %c0_26 = arith.constant 0 : index
      %c0_27 = arith.constant 0 : index
      %47 = vector.load %arg9[%c0_26, %c0_27] : memref<8x32xf32, #tpu.memory_space<vmem>>, vector<8x32xf32>
      %c0_28 = arith.constant 0 : index
      %c0_29 = arith.constant 0 : index
      %48 = vector.load %arg6[%c0_28, %c0_29] : memref<32x32xf32, #tpu.memory_space<vmem>>, vector<32x32xf32>
      %cst_30 = arith.constant dense<0.000000e+00> : vector<8x32xf32>
      %49 = tpu.matmul %47, %48, %cst_30 {dimension_numbers = #tpu.dot_dimension_numbers<[1], [1], [0], [0], [0, 0, 1, 0], [], []>} : vector<8x32xf32>, vector<32x32xf32>, vector<8x32xf32> -> vector<8x32xf32>
      %c0_31 = arith.constant 0 : index
      %c0_32 = arith.constant 0 : index
      %c0_33 = arith.constant 0 : index
      %50 = vector.load %arg7[%c0_31, %c0_32, %c0_33] : memref<1x8x32xf32, #tpu.memory_space<vmem>>, vector<1x8x32xf32>
      %51 = vector.shape_cast %50 : vector<1x8x32xf32> to vector<8x32xf32>
      %52 = vector.shape_cast %49 : vector<8x32xf32> to vector<1x8x32xf32>
      tpu.vector_store %arg7[%c0_31, %c0_32, %c0_33], %52 {strides = array<i32>} : memref<1x8x32xf32, #tpu.memory_space<vmem>>, vector<1x8x32xf32>,
    } else {
    }
    return
  }
  func.func @transform_0(%arg0: i32, %arg1: i32) -> (i32, i32, i32) {
    %c0_i32 = arith.constant 0 : i32
    %c0_i32_0 = arith.constant 0 : i32
    return %arg0, %arg1, %c0_i32 : i32, i32, i32
  }
  func.func @transform_1(%arg0: i32, %arg1: i32) -> (i32, i32, i32) {
    %c0_i32 = arith.constant 0 : i32
    %c0_i32_0 = arith.constant 0 : i32
    %c0_i32_1 = arith.constant 0 : i32
    return %arg0, %c0_i32, %c0_i32_0 : i32, i32, i32
  }
  func.func @transform_2(%arg0: i32, %arg1: i32) -> (i32, i32) {
    %c0_i32 = arith.constant 0 : i32
    %c0_i32_0 = arith.constant 0 : i32
    %c0_i32_1 = arith.constant 0 : i32
    return %c0_i32, %c0_i32_0 : i32, i32
  }
  func.func @transform_3(%arg0: i32, %arg1: i32) -> (i32, i32) {
    %c0_i32 = arith.constant 0 : i32
    %c0_i32_0 = arith.constant 0 : i32
    %c0_i32_1 = arith.constant 0 : i32
    return %c0_i32, %c0_i32_0 : i32, i32
  }
  func.func @transform_4(%arg0: i32, %arg1: i32) -> (i32, i32) {
    %c0_i32 = arith.constant 0 : i32
    %c0_i32_0 = arith.constant 0 : i32
    %c0_i32_1 = arith.constant 0 : i32
    return %c0_i32, %c0_i32_0 : i32, i32
  }
  func.func @transform_5(%arg0: i32, %arg1: i32) -> (i32, i32, i32) {
    %c0_i32 = arith.constant 0 : i32
    %c0_i32_0 = arith.constant 0 : i32
    %c0_i32_1 = arith.constant 0 : i32
    return %arg0, %c0_i32, %c0_i32_0 : i32, i32, i32
  }
  func.func @transform_6(%arg0: i32, %arg1: i32) -> (i32, i32, i32) {
    %c0_i32 = arith.constant 0 : i32
    %c0_i32_0 = arith.constant 0 : i32
    return %arg0, %arg1, %c0_i32 : i32, i32, i32
  }
}

</mosaic_0001>

<bundles_post_ra>
// kernel: tpu_custom_call.1
= control target key start
LH: loop header
LB: loop body
LE: loop exit
PB: predicated region body
PF: predicated region fallthrough
CT: control target
= control target key end

     0   :  { %s1175_s0 = inlined_call_operand.vmem [shape: f32[2,8,32], index: 0, kind: input, shape index: {}]   ;;  %s1176_s1 = inlined_call_operand.vmem [shape: f32[2,8,32], index: 1, kind: input, shape index: {}]   ;;  %s1177_s2 = inlined_call_operand.vmem [shape: f32[64,32], index: 2, kind: input, shape index: {}]   ;;  %s1178_s3 = inlined_call_operand.vmem [shape: f32[32,32], index: 3, kind: input, shape index: {}]   ;;  %s1179_s4 = inlined_call_operand.vmem [shape: f32[32,32], index: 4, kind: input, shape index: {}]   ;;  %s1180_s5 = inlined_call_operand.hbm [shape: f32[2,8,32], index: 5, kind: output, shape index: {0}]   ;;  %s1181_s6 = inlined_call_operand.hbm [shape: f32[2,8,8], index: 6, kind: output, shape index: {1}]  }
   0x1   :  { %1183 = sst [smem:[#allocation9_spill]] %s1175_s0 }
   0x2   :  { %1184 = sst [smem:[#allocation10_spill]] %s1176_s1 }
   0x3   :  { %12 = vsyncpa [#allocation4], 0 }
   0x4   :  { %14 = vsyncpa [#allocation4 + $0x1], 0 }
   0x5   :  { %15 = vsyncpa [#allocation6], 0 }
   0x6   :  { %17 = vsyncpa [#allocation6 + $0x1], 0  ;;  %s977_s21 = smov 0   ;;  %s979_s22 = smov 0  }
   0x7   :  { %s981_s23 = smov 0   ;;  %s983_s24 = smov 0  }
   0x8   :  { %s985_s25 = smov 0   ;;  %s987_s26 = smov 0  }
   0x9 LB: > { %s725_s27 = sadd.s32 4294967295, %s938_s26   ;;  %s726_s28 = sadd.s32 4294967294, %s938_s26   ;;  %s938_s26 = sphi %s987_s26, %s23_s26   ;;  %s934_s25 = sphi %s985_s25, %s1194_s25   ;;  %s930_s24 = sphi %s983_s24, %s1193_s24   ;;  %s926_s23 = sphi %s981_s23, %s1192_s23   ;;  %s922_s22 = sphi %s979_s22, %s1191_s22   ;;  %s918_s21 = sphi %s977_s21, %s1190_s21  }
   0xa   : > { %s35_s29 = sadd.s32 1, %s934_s25  ;;  %s159_s30 = sadd.s32 1, %s926_s23 }
   0xb   : > { %p37_p0 = scmp.ge.s32.totalorder %s35_s29, 2  ;;  %p169_p1 = scmp.ne.s32.totalorder %s926_s23, %s922_s22 }
   0xc   : > { %p170_p2 = scmp.eq.s32.totalorder %s725_s27, 1  ;;  %p175_p3 = scmp.ne.s32.totalorder %s922_s22, %s918_s21 }
   0xd   : > { %s1196_s29 = smov (%p37_p0, %s35_s29), 0  ;;  %p176_p5 = scmp.eq.s32.totalorder %s726_s28, 1 }
   0xe   : > { %p1017_p4 = por %p170_p2, %p169_p1  ;;  %s156_s8 = ssub.s32 %s934_s25, %s1196_s29 }
   0xf   : > { %p729_p6 = scmp.ge.s32.totalorder %s938_s26, 1  ;;  %p157_p7 = scmp.eq.s32.totalorder %s156_s8, 0 }
  0x10   : > { %p1024_p8 = por %p176_p5, %p175_p3  ;;  %p248_p9 = scmp.lt.s32.totalorder %s938_s26, 3 }
  0x11   : > { %s1030_s10 = scalar_select %p157_p7, %s926_s23, %s159_s30  }
  0x12   : > { %p249_p10 = pnand %p729_p6, %p248_p9 }
  0x13   : > { %p289_p11 = scmp.lt.s32.totalorder (!%p249_p10), %s930_s24, 1  ;;  %s1187_s1 = sld [smem:[#allocation10_spill]] (!%p249_p10) }
  0x14   : > { %252 = sbr.rel (%p249_p10) target bundleno = 1022 (0x3fe), region = 40  ;;  %s1188_s0 = sld [smem:[#allocation9_spill]] (!%p249_p10) }
  0x15   : > { %s940_s16 = smov (!%p249_p10), 96   ;;  %s758_s14 = sshll.u32 (!%p249_p10), %s930_s24, 3 }
  0x19   : > { %vm304_vm0 = vcmask 261120   ;;  %v315_v0 = vld [vmem:[%s1177_s2 + $0x38] sm:$0xff]  ;;  %v314_v2 = vld [vmem:[%s1177_s2 + $0x30] sm:$0xff]  ;;  %s290_s19 = scalar_select %p289_p11, %s930_s24, 1  ;;  %v313_v4 = vld [vmem:[%s1177_s2 + $0x28] sm:$0xff]  ;;  %v430_v16 = vlaneseq  ;;  %vm442_vm3 = vcmask 64512  }
  0x1a   : > { %734 = vmatpush.xpose.msk.msra.mxu0 %vm304_vm0, %v315_v0  ;;  %v368_v1 = vld [vmem:[%s1178_s3 + $0x18] sm:$0xff]  ;;  %v367_v3 = vld [vmem:[%s1178_s3 + $0x10] sm:$0xff]  ;;  %v366_v5 = vld [vmem:[%s1178_s3 + $0x8] sm:$0xff]  ;;  %v941_v44 = vmov 0.0   ;;  %s848_s24 = scalar_lea.hbm %s1181_s6, 16 }
  0x1b   : > { %743 = vmatpush.xpose.msk.msra.mxu1 %vm304_vm0, %v368_v1  ;;  %s732_s8 = sshll.u32 %s290_s19, 3  ;;  %v312_v6 = vld [vmem:[%s1177_s2 + $0x20] sm:$0xff]  ;;  %v311_v8 = vld [vmem:[%s1177_s2 + $0x18] sm:$0xff]  ;;  %v310_v10 = vld [vmem:[%s1177_s2 + $0x10] sm:$0xff]  ;;  %v431_v18 = vshrl.u32 %v430_v16, 7  ;;  %v435_v19 = vand.u32 127, %v430_v16  ;;  %s604_s19 = scalar_lea.hbm %s1181_s6, %s758_s14 }
  0x1c   : > { %v365_v7 = vld [vmem:[%s1178_s3] sm:$0xff]  ;;  %s299_s17 = scalar_lea.vmem %s1187_s1, %s732_s8  ;;  %v309_v11 = vld [vmem:[%s1177_s2 + $0x8] sm:$0xff]  ;;  %s295_s15 = scalar_lea.vmem %s1188_s0, %s732_s8  ;;  %v536_v43 = vld [vmem:[%s1179_s4 + $0x18] sm:$0xff]  ;;  %305 = vst.msk [vmem:[#allocation2] sm:$0xff] %vm304_vm0, %v941_v44 }
  0x1d   : > { %v364_v9 = vld [vmem:[%s299_s17] sm:$0xff]  ;;  %v436_v20 = vsub.s32 %v431_v18, %v435_v19  ;;  %s1095_s8 = sand.u32 1, %s922_s22   ;;  %v535_v46 = vld [vmem:[%s1179_s4 + $0x10] sm:$0xff]  ;;  %v534_v47 = vld [vmem:[%s1179_s4 + $0x8] sm:$0xff]  ;;  %s608_s27 = sshll.u32 %s604_s19, 4  ;;  %s609_s27 = int_to_ptr.hbm [resolvable:$true] %s608_s27 }
  0x1e   : > { %735 = vmatpush.xpose.msk.msra.mxu0 %vm304_vm0, %v314_v2  ;;  %v308_v12 = vld [vmem:[%s1177_s2] sm:$0xff]  ;;  %s1182_s17 = sshll.u32 %s1095_s8, 3  ;;  %s579_s28 = scalar_lea.sflag [#allocation6], %s1095_s8 }
  0x1f   : > { %744 = vmatpush.xpose.msk.msra.mxu1 %vm304_vm0, %v367_v3  ;;  %v307_v13 = vld [vmem:[%s295_s15] sm:$0xff]  ;;  %v438_v21 = vsub.s32 0, %v436_v20  ;;  %vm437_vm1 = vcmp.lt.s32.totalorder %v436_v20, 0  ;;  %s288_s18 = scalar_lea.vmem [#allocation5], %s1182_s17  ;;  %s842_s30 = sshra.s32 %s609_s27, 4  ;;  %s843_s30 = int_to_ptr.hbm [resolvable:$true] %s842_s30 }
  0x20   : > { %v533_v48 = vld [vmem:[%s1179_s4] sm:$0xff]  ;;  %s606_s20 = sshll.u32 %s288_s18, 4  ;;  %s844_s11 = scalar_lea.hbm %s843_s30, 8  ;;  %s607_s20 = int_to_ptr.vmem [resolvable:$true] %s606_s20 }
  0x21   : > { %v439_v22 = vsel %vm437_vm1, %v438_v21, %v436_v20  ;;  %p845_p12 = scmp.ne.s32.totalorder %s843_s30, %s844_s11  ;;  %p849_p1 = scmp.lt.s32.totalorder %s843_s30, %s1181_s6 }
  0x22   : > { %736 = vmatpush.xpose.msk.msra.mxu0 %vm304_vm0, %v313_v4  ;;  %vm440_vm2 = vcmp.ge.s32.totalorder %v439_v22, 4  ;;  %p850_p2 = scmp.lt.s32.totalorder %s848_s24, %s844_s11 }
  0x23   : > { %745 = vmatpush.xpose.msk.msra.mxu1 %vm304_vm0, %v366_v5  ;;  %v526_v49 = vld [vmem:[#allocation2] sm:$0xff]  ;;  %p846_p13 = pnand %p845_p12, %p1017_p4 }
  0x24   : > { %p851_p3 = por %p850_p2, %p849_p1 }
  0x25   : > { %p847_p0 = pneg %p846_p13 }
  0x26   : > { %737 = vmatpush.xpose.msk.msra.mxu0 %vm304_vm0, %v312_v6 }
  0x27   : > { %746 = vmatpush.xpose.msk.msra.mxu1 %vm304_vm0, %v365_v7  ;;  %p852_p5 = pnand %p851_p3, %p847_p0 }
  0x2a   : > { %738 = vmatpush.xpose.msk.msra.mxu0 %vm304_vm0, %v311_v8  ;;  %747 = vmatmul.msk.f32.vlgmr.msra.gmra.mxu1 %vm304_vm0, %v364_v9 }
  0x2e   : > { %739 = vmatpush.xpose.msk.msra.mxu0 %vm304_vm0, %v310_v10 }
  0x32   : > { %740 = vmatpush.xpose.msk.msra.mxu0 %vm304_vm0, %v309_v11 }
  0x36   : > { %741 = vmatpush.xpose.msk.msra.mxu0 %vm304_vm0, %v308_v12 }
  0x39   : > { %742 = vmatmul.msk.f32.vlgmr.msra.gmra.mxu0 %vm304_vm0, %v307_v13 }
  0xa7   : > { %v401_v14 = vpop.f32.mrf.mxu1 }
  0xa8   : > { %748 = vmatpush.xpose.msk.msra.mxu2 %vm304_vm0, %v401_v14 }
  0xb6   : > { %v361_v15 = vpop.f32.mrf.mxu0 }
  0xb7   : > { %500 = vrot.lane.b32.xlu1 %v361_v15, %s940_s16  ;;  %749 = vmatmul.msk.f32.vlgmr.msra.gmra.mxu2 %vm304_vm0, %v361_v15 }
 0x129   : > { %v501_v17 = vpop.permute.xlu1 %500 }
 0x12a   : > { %521 = vmatpush.msra.mxu3 %v501_v17 }
 0x12c   : > { %751 = vmatpush.xpose.msk.msrb.mxu3 %vm304_vm0, %v536_v43 }
 0x130   : > { %752 = vmatpush.xpose.msk.msrb.mxu3 %vm304_vm0, %v535_v46 }
 0x134   : > { %753 = vmatpush.xpose.msk.msrb.mxu3 %vm304_vm0, %v534_v47 }
 0x138   : > { %754 = vmatpush.xpose.msk.msrb.mxu3 %vm304_vm0, %v533_v48 }
 0x13a   : > { %v427_v23 = vpop.f32.mrf.mxu2 }
 0x13b   : > { %v441_v24 = vsel %vm440_vm2, -inf, %v427_v23 }
 0x13c   : > { %v443_v25 = vsel %vm442_vm3, %v441_v24, -inf }
 0x13d   : > { %444 = vmax.xlane.f32.xlu0 %v443_v25 }
 0x1b0   : > { %v445_v26 = vpop.xlane.xlu0 %444 }
 0x1b1   : > { %v446_v27 = vsub.f32 %v441_v24, %v445_v26 }
 0x1b3   : > { %v447_v28 = vmul.f32 1.442695, %v446_v27 }
 0x1b5   : > { %824 = vpow2.f32 %v447_v28 }
 0x1bb   : > { %v825_v29 = vpop.eup %824 }
 0x1bc   : > { %v449_v30 = vsel %vm442_vm3, %v825_v29, 0.0 }
 0x1bd   : > { %450 = vadd.xlane.f32.xlu0 %v449_v30 }
 0x230   : > { %v451_v31 = vpop.xlane.xlu0 %450 }
 0x231   : > { %826 = vrcp.f32 %v451_v31  ;;  %v463_v35 = vand.u32 2147483648, %v451_v31  ;;  %v461_v37 = vand.u32 2147483647, %v451_v31  ;;  %vm457_vm5 = vweird.f32 %v451_v31 }
 0x233   : > { %v464_v39 = vor.u32 1.1754944e-38, %v463_v35  ;;  %vm462_vm7 = vcmp.eq.f32.partialorder %v461_v37, 8.507059e+37 }
 0x237   : > { %v827_v32 = vpop.eup %826 }
 0x238   : > { %v453_v33 = vmul.f32 %v827_v32, %v451_v31  ;;  %vm458_vm4 = vweird.f32 %v827_v32 }
 0x239   : > { %vm459_vm6 = vmor %vm457_vm5, %vm458_vm4 }
 0x23a   : > { %v454_v34 = vsub.f32 1.0, %v453_v33 }
 0x23c   : > { %v455_v36 = vmul.f32 %v827_v32, %v454_v34 }
 0x23e   : > { %v456_v38 = vadd.f32 %v827_v32, %v455_v36 }
 0x240   : > { %v460_v40 = vsel %vm459_vm6, %v827_v32, %v456_v38 }
 0x241   : > { %v465_v41 = vsel %vm462_vm7, %v464_v39, %v460_v40 }
 0x242   : > { %v466_v42 = vmul.f32 %v825_v29, %v465_v41 }
 0x244   : > { %468 = vxpose.xlu1.b32.start.end [1/1] (short) (narrow) %v466_v42, 8  ;;  %467 = vst.msk [vmem:[%s288_s18] sm:$0xff] %vm442_vm3, %v466_v42 }
 0x2e8   : > { %v484_v45 = vpop.trf.xlu1 }
 0x2e9   : > { %750 = vmatmul.msk.f32.vlgmr.msra.gmra.mxu3 %vm442_vm3, %v484_v45 }
 0x36c   : > { %v523_v50 = vpop.f32.mrf.mxu3 }
 0x36d   : > { %v527_v51 = vadd.f32 %v526_v49, %v523_v50 }
 0x36f   : > { %528 = vst.msk [vmem:[#allocation2] sm:$0xff] %vm304_vm0, %v527_v51 }
 0x376   : > { %v532_v52 = vld [vmem:[#allocation2] sm:$0xff] }
 0x377   : > { %755 = vmatmul.msk.f32.vlgmr.msrb.gmra.mxu3 %vm304_vm0, %v532_v52 }
 0x378   : > { %855 = shalt.err (!%p852_p5)
}
 0x379   : > { %763 = dma.vmem_to_hbm [thread:$0]  (%p1017_p4), %s607_s20, 128, %s609_s27, %s579_s28  }
 0x37a   : > { %s589_s16 = scalar_lea.hbm %s1180_s5, %s758_s14  ;;  %s1189_s19 = sshll.u32 %s1095_s8, 3 }
 0x37b   : > { %s281_s12 = scalar_lea.vmem [#allocation3], %s1189_s19  ;;  %s593_s1 = sshll.u32 %s589_s16, 4  ;;  %s594_s1 = int_to_ptr.hbm [resolvable:$true] %s593_s1 }
 0x37c   : > { %s591_s13 = sshll.u32 %s281_s12, 4  ;;  %s574_s0 = scalar_lea.sflag [#allocation4], %s1095_s8  ;;  %s592_s13 = int_to_ptr.vmem [resolvable:$true] %s591_s13 }
 0x37d   : > { %s870_s17 = sshra.s32 %s594_s1, 4  ;;  %s876_s14 = scalar_lea.hbm %s1180_s5, 16  ;;  %s871_s17 = int_to_ptr.hbm [resolvable:$true] %s870_s17 }
 0x37e   : > { %s872_s30 = scalar_lea.hbm %s871_s17, 8  ;;  %p877_p10 = scmp.lt.s32.totalorder %s871_s17, %s1180_s5 }
 0x37f   : > { %p873_p6 = scmp.ne.s32.totalorder %s871_s17, %s872_s30  ;;  %p878_p11 = scmp.lt.s32.totalorder %s876_s14, %s872_s30 }
 0x381   : > { %p874_p7 = pnand %p873_p6, %p1017_p4  ;;  %p879_p12 = por %p878_p11, %p877_p10 }
 0x383   : > { %p875_p9 = pneg %p874_p7 }
 0x385   : > { %p880_p13 = pnand %p879_p12, %p875_p9 }
 0x3fa   : > { %v569_v53 = vpop.f32.mrf.mxu3 }
 0x3fb   : > { %572 = vst.msk [vmem:[%s281_s12] sm:$0xff] %vm304_vm0, %v569_v53 }
 0x3fc   : > { %883 = shalt.err (!%p880_p13)
}
 0x3fd   : > { %762 = dma.vmem_to_hbm [thread:$0]  (%p1017_p4), %s592_s13, 128, %s594_s1, %s574_s0  }
 0x3fe PF: > { %p773_p0 = scmp.ge.s32.totalorder %s938_s26, 2  ;;  %s620_s8 = sand.u32 1, %s918_s21  }
 0x3ff   : > { %s621_s24 = scalar_lea.sflag [#allocation4], %s620_s8 }
 0x400   : > { %p767_p1 = pnand %p773_p0, %p1024_p8 }
 0x402   : > { %p768_p2 = pneg %p767_p1 }
 0x404   : > { %909 = dma.done.wait (%p768_p2), %s621_s24, 128  }
 0x405   : > { %911 = vsyncadd (%p768_p2), %s621_s24, 4294967168  ;;  %s631_s18 = scalar_lea.sflag [#allocation6], %s620_s8 }
 0x406   : > { %913 = dma.done.wait (%p768_p2), %s631_s18, 128  }
 0x407   : > { %915 = vsyncadd (%p768_p2), %s631_s18, 4294967168  ;;  %s23_s26 = sadd.s32 1, %s938_s26   ;;  %s1190_s21 = smov %s922_s22 }
 0x408   : > { %p20_p3 = scmp.ge.s32.totalorder %s23_s26, 4   ;;  %s1191_s22 = smov %s926_s23 }
 0x409   : > { %s1192_s23 = smov %s1030_s10  ;;  %s1193_s24 = smov %s934_s25 }
 0x40a   : > { %s1194_s25 = smov %s1196_s29  ;;  %22 = sbr.rel (!%p20_p3) target bundleno = 9 (0x9), region = 103 }
 0x40f   :  { %637 = vsyncpa [#allocation4], 1 }
 0x410   :  { %639 = vsyncpa [#allocation4 + $0x1], 1 }
 0x411   :  { %640 = vsyncpa [#allocation6], 1 }
 0x412   :  { %642 = vsyncpa [#allocation6 + $0x1], 1 }

</bundles_post_ra>
